<compile_context>
chip_gen: v6e
topology: v6e:2x2x1
jax: 0.10.0
libtpu: 0.0.40
codegen_flags: <defaults>
</compile_context>

<pallas_src>
import functools

import jax
import jax.numpy as jnp
from jax.experimental import pallas as pl
from jax.experimental.pallas import tpu as pltpu

_SMOOTH = 1e-5
_N_STATS = 5  # [C_count, S_count, intersect, y_sum, z_sum]


def _bdou_stats_kernel(pred_ref, target_ref, out_ref, *, apply_sigmoid, unroll):
    """Accumulates per-class statistics over the batch (reduction) axis.

    pred_ref / target_ref : VMEM tiles of shape (Bt, 1, H, W) (native dtype)
    out_ref               : VMEM (1, 8, 128) fp32 per-class accumulator,
                            resident across the batch grid axis.
    """
    b = pl.program_id(1)  # batch-block index (innermost / reduction axis)

    @pl.when(b == 0)
    def _init():
        out_ref[...] = jnp.zeros_like(out_ref)

    bt = pred_ref.shape[0]
    H, W = pred_ref.shape[2], pred_ref.shape[3]

    # Border masks for the 3x3 cross conv (zero padding), hoisted out of the
    # per-image loop and applied as 0/1 multipliers.
    rows = jax.lax.broadcasted_iota(jnp.int32, (H, W), 0)
    cols = jax.lax.broadcasted_iota(jnp.int32, (H, W), 1)
    m_up = (rows > 0).astype(jnp.float32)        # valid for t[i-1, j]
    m_down = (rows < H - 1).astype(jnp.float32)  # valid for t[i+1, j]
    m_left = (cols > 0).astype(jnp.float32)      # valid for t[i, j-1]
    m_right = (cols < W - 1).astype(jnp.float32)  # valid for t[i, j+1]

    def body(i, carry):
        c_cnt, s_cnt, inter, y_sum, z_sum = carry
        s = pred_ref[i, 0, :, :].astype(jnp.float32)    # (H, W)
        if apply_sigmoid:
            # Fused sigmoid: EUP exp + divide (no extra HBM pass of pred).
            s = 1.0 / (1.0 + jnp.exp(-s))
        t = target_ref[i, 0, :, :].astype(jnp.float32)  # (H, W)

        # 3x3 cross-kernel conv with padding=1, via masked shifted copies.
        conv = (t
                + m_up * jnp.roll(t, 1, axis=0)      # t[i-1, j]
                + m_down * jnp.roll(t, -1, axis=0)   # t[i+1, j]
                + m_left * jnp.roll(t, 1, axis=1)    # t[i, j-1]
                + m_right * jnp.roll(t, -1, axis=1))  # t[i, j+1]

        y = conv * t
        # count_nonzero(Y) after Y[Y==5]=0  ==  count(y != 0 and y != 5)
        boundary = jnp.logical_and(y != 0.0, y != 5.0)

        c_cnt = c_cnt + jnp.sum(boundary.astype(jnp.float32))
        s_cnt = s_cnt + jnp.sum((t != 0.0).astype(jnp.float32))
        inter = inter + jnp.sum(s * t)
        y_sum = y_sum + jnp.sum(t * t)
        z_sum = z_sum + jnp.sum(s * s)
        return c_cnt, s_cnt, inter, y_sum, z_sum

    zero = jnp.float32(0.0)
    c_cnt, s_cnt, inter, y_sum, z_sum = jax.lax.fori_loop(
        0, bt, body, (zero, zero, zero, zero, zero), unroll=unroll)

    # Pack the 5 scalars into one (8, 128) vreg-shaped slab (stat k lives in
    # sublane row k) and accumulate into the resident per-class output block.
    row = jax.lax.broadcasted_iota(jnp.int32, (8, 128), 0)
    stats = jnp.where(row == 0, c_cnt, 0.0)
    stats = jnp.where(row == 1, s_cnt, stats)
    stats = jnp.where(row == 2, inter, stats)
    stats = jnp.where(row == 3, y_sum, stats)
    stats = jnp.where(row == 4, z_sum, stats)
    out_ref[0] += stats


def _pick_batch_tile(B, H, W, pred_dtype, target_dtype, budget_bytes=12 << 20):
    """Largest divisor of B whose double-buffered input DMAs fit the budget."""
    per_image = 2 * H * W * (jnp.dtype(pred_dtype).itemsize
                             + jnp.dtype(target_dtype).itemsize)
    cap = max(1, budget_bytes // max(per_image, 1))
    bt = 1
    for d in range(1, B + 1):
        if B % d == 0 and d <= cap:
            bt = d
    return bt


def boundary_dou_loss(pred, target, *, n_classes=2, loss_weight=1.0,
                      use_sigmoid=False):
    """JAX/Pallas equivalent of BoundaryDoULoss.forward (NCHW inputs)."""
    assert pred.shape == target.shape, "predict & target shape do not match"
    B, C, H, W = pred.shape
    assert C == n_classes

    bt = _pick_batch_tile(B, H, W, pred.dtype, target.dtype)
    # Keep the rolled loop for big images (bounds VMEM live ranges); unroll for
    # small ones (LLO scheduler visibility).
    unroll = (H * W) <= 128 * 128

    kernel = functools.partial(
        _bdou_stats_kernel, apply_sigmoid=bool(use_sigmoid), unroll=unroll)

    stats = pl.pallas_call(
        kernel,
        out_shape=jax.ShapeDtypeStruct((n_classes, 8, 128), jnp.float32),
        grid_spec=pltpu.PrefetchScalarGridSpec(
            num_scalar_prefetch=0,
            grid=(n_classes, B // bt),  # batch blocks = innermost reduction axis
            in_specs=[
                pl.BlockSpec((bt, 1, H, W), lambda c, b: (b, c, 0, 0)),
                pl.BlockSpec((bt, 1, H, W), lambda c, b: (b, c, 0, 0)),
            ],
            # One lane-dense (8,128) accumulator block per class, resident
            # across the batch axis.  Class-keyed blocks make the class axis
            # safe to shard across TensorCores (v7x megacore).
            out_specs=pl.BlockSpec((1, 8, 128), lambda c, b: (c, 0, 0)),
        ),
        compiler_params=pltpu.CompilerParams(
            dimension_semantics=("parallel", "arbitrary"),
            vmem_limit_bytes=32 * 1024 * 1024,
        ),
    )(pred, target)

    c_cnt = stats[:, 0, 0]
    s_cnt = stats[:, 1, 0]
    inter = stats[:, 2, 0]
    y_sum = stats[:, 3, 0]
    z_sum = stats[:, 4, 0]

    alpha = 1.0 - (c_cnt + _SMOOTH) / (s_cnt + _SMOOTH)
    alpha = 2.0 * alpha - 1.0
    alpha = jnp.minimum(alpha, 0.8)
    loss_per_class = (z_sum + y_sum - 2.0 * inter + _SMOOTH) / (
        z_sum + y_sum - (1.0 + alpha) * inter + _SMOOTH)
    return loss_weight * jnp.sum(loss_per_class) / n_classes


def _reference_loss(pred, target, n_classes=2, loss_weight=1.0,
                    use_sigmoid=False):
    """Pure-JAX reference mirroring the PyTorch code, for validation."""
    pred = pred.astype(jnp.float32)
    target = target.astype(jnp.float32)
    if use_sigmoid:
        pred = 1.0 / (1.0 + jnp.exp(-pred))
    total = jnp.float32(0.0)
    for i in range(n_classes):
        s = pred[:, i]
        t = target[:, i]
        tp = jnp.pad(t, ((0, 0), (1, 1), (1, 1)))
        conv = (tp[:, 1:-1, 1:-1] + tp[:, :-2, 1:-1] + tp[:, 2:, 1:-1]
                + tp[:, 1:-1, :-2] + tp[:, 1:-1, 2:])
        y = conv * t
        y = jnp.where(y == 5.0, 0.0, y)
        C = jnp.count_nonzero(y).astype(jnp.float32)
        S = jnp.count_nonzero(t).astype(jnp.float32)
        alpha = 1.0 - (C + _SMOOTH) / (S + _SMOOTH)
        alpha = 2.0 * alpha - 1.0
        alpha = jnp.minimum(alpha, 0.8)
        inter = jnp.sum(s * t)
        y_sum = jnp.sum(t * t)
        z_sum = jnp.sum(s * s)
        total += loss_weight * (z_sum + y_sum - 2.0 * inter + _SMOOTH) / (
            z_sum + y_sum - (1.0 + alpha) * inter + _SMOOTH)
    return total / n_classes


if __name__ == "__main__":
    key = jax.random.PRNGKey(0)
    B, C, H, W = 2, 2, 16, 16  # n_classes=2 (module default)
    k1, k2 = jax.random.split(key)

    # Deterministic synthetic inputs in their *native* (low precision) dtypes —
    # the wrapper does not upcast; the kernel casts per-tile after the DMA.
    logits = jax.random.normal(k1, (B, C, H, W), jnp.float32)
    pred = jax.nn.softmax(logits, axis=1).astype(jnp.bfloat16)
    labels = jax.random.randint(k2, (B, H, W), 0, C)
    target = jax.nn.one_hot(labels, C, axis=1, dtype=jnp.bfloat16)

    # Default path (probabilities already given).
    loss = jax.block_until_ready(boundary_dou_loss(pred, target, n_classes=C))
    ref = jax.block_until_ready(_reference_loss(pred, target, n_classes=C))
    assert jnp.allclose(loss, ref, rtol=1e-5, atol=1e-5), (float(loss), float(ref))

    # Fused in-kernel sigmoid path (use_sigmoid=True) on raw logits.
    raw = logits.astype(jnp.bfloat16)
    loss_sig = jax.block_until_ready(
        boundary_dou_loss(raw, target, n_classes=C, use_sigmoid=True))
    ref_sig = jax.block_until_ready(
        _reference_loss(raw, target, n_classes=C, use_sigmoid=True))
    assert jnp.allclose(loss_sig, ref_sig, rtol=1e-4, atol=1e-5), (
        float(loss_sig), float(ref_sig))

    print("KERNEL_OK")
</pallas_src>

<mosaic_0001>
module attributes {stable_mosaic.version = 11 : i64} {
  func.func @_bdou_stats_kernel(%arg0: i32, %arg1: i32, %arg2: memref<2x1x16x16xbf16, #tpu.memory_space<vmem>>, %arg3: memref<2x1x16x16xbf16, #tpu.memory_space<vmem>>, %arg4: memref<1x8x128xf32, #tpu.memory_space<vmem>>) attributes {dimension_semantics = [#tpu.dimension_semantics<parallel>, #tpu.dimension_semantics<arbitrary>], iteration_bounds = array<i64: 2, 1>, scalar_prefetch = 0 : i64, scratch_operands = 0 : i64, tpu.core_type = #tpu.core_type<tc>, window_params = [{transform_indices = @transform_0, window_bounds = array<i64: 2, 1, 16, 16>}, {transform_indices = @transform_1, window_bounds = array<i64: 2, 1, 16, 16>}, {transform_indices = @transform_2, window_bounds = array<i64: 1, 8, 128>}]} {
    %c0_i32 = arith.constant 0 : i32
    %0 = arith.cmpi eq, %arg1, %c0_i32 : i32
    %1 = arith.extui %0 : i1 to i32
    %c0_i32_0 = arith.constant 0 : i32
    %2 = arith.cmpi ne, %1, %c0_i32_0 : i32
    scf.if %2 {
      %cst_46 = arith.constant 0.000000e+00 : f32
      %185 = vector.broadcast %cst_46 : f32 to vector<1x8x128xf32>
      %c0_47 = arith.constant 0 : index
      %c0_48 = arith.constant 0 : index
      %c0_49 = arith.constant 0 : index
      %186 = vector.load %arg4[%c0_47, %c0_48, %c0_49] : memref<1x8x128xf32, #tpu.memory_space<vmem>>, vector<1x8x128xf32>
      tpu.vector_store %arg4[%c0_47, %c0_48, %c0_49], %185 {strides = array<i32>} : memref<1x8x128xf32, #tpu.memory_space<vmem>>, vector<1x8x128xf32>,
    } else {
    }
    %3 = tpu.iota {dimensions = array<i32: 0>} : vector<16x16xi32>
    %4 = tpu.iota {dimensions = array<i32: 1>} : vector<16x16xi32>
    %c0_i32_1 = arith.constant 0 : i32
    %5 = vector.broadcast %c0_i32_1 : i32 to vector<16x16xi32>
    %6 = arith.cmpi sgt, %3, %5 : vector<16x16xi32>
    %7 = arith.extui %6 : vector<16x16xi1> to vector<16x16xi32>
    %8 = arith.sitofp %7 : vector<16x16xi32> to vector<16x16xf32>
    %c15_i32 = arith.constant 15 : i32
    %9 = vector.broadcast %c15_i32 : i32 to vector<16x16xi32>
    %10 = arith.cmpi slt, %3, %9 : vector<16x16xi32>
    %11 = arith.extui %10 : vector<16x16xi1> to vector<16x16xi32>
    %12 = arith.sitofp %11 : vector<16x16xi32> to vector<16x16xf32>
    %c0_i32_2 = arith.constant 0 : i32
    %13 = vector.broadcast %c0_i32_2 : i32 to vector<16x16xi32>
    %14 = arith.cmpi sgt, %4, %13 : vector<16x16xi32>
    %15 = arith.extui %14 : vector<16x16xi1> to vector<16x16xi32>
    %16 = arith.sitofp %15 : vector<16x16xi32> to vector<16x16xf32>
    %c15_i32_3 = arith.constant 15 : i32
    %17 = vector.broadcast %c15_i32_3 : i32 to vector<16x16xi32>
    %18 = arith.cmpi slt, %4, %17 : vector<16x16xi32>
    %19 = arith.extui %18 : vector<16x16xi1> to vector<16x16xi32>
    %20 = arith.sitofp %19 : vector<16x16xi32> to vector<16x16xf32>
    %cst = arith.constant 0.000000e+00 : f32
    %cst_4 = arith.constant 0.000000e+00 : f32
    %cst_5 = arith.constant 0.000000e+00 : f32
    %cst_6 = arith.constant 0.000000e+00 : f32
    %cst_7 = arith.constant 0.000000e+00 : f32
    %c0_i32_8 = arith.constant 0 : i32
    %21 = arith.index_cast %c0_i32_8 : i32 to index
    %c0 = arith.constant 0 : index
    %c0_9 = arith.constant 0 : index
    %c0_10 = arith.constant 0 : index
    %22 = vector.load %arg2[%21, %c0, %c0_9, %c0_10] : memref<2x1x16x16xbf16, #tpu.memory_space<vmem>>, vector<1x1x16x16xbf16>
    %23 = vector.shape_cast %22 : vector<1x1x16x16xbf16> to vector<16x16xbf16>
    %24 = arith.extf %23 : vector<16x16xbf16> to vector<16x16xf32>
    %25 = arith.index_cast %c0_i32_8 : i32 to index
    %c0_11 = arith.constant 0 : index
    %c0_12 = arith.constant 0 : index
    %c0_13 = arith.constant 0 : index
    %26 = vector.load %arg3[%25, %c0_11, %c0_12, %c0_13] : memref<2x1x16x16xbf16, #tpu.memory_space<vmem>>, vector<1x1x16x16xbf16>
    %27 = vector.shape_cast %26 : vector<1x1x16x16xbf16> to vector<16x16xbf16>
    %28 = arith.extf %27 : vector<16x16xbf16> to vector<16x16xf32>
    %29 = vector.extract_strided_slice %28 {offsets = [15, 0], sizes = [1, 16], strides = [1, 1]} : vector<16x16xf32> to vector<1x16xf32>
    %30 = vector.extract_strided_slice %28 {offsets = [0, 0], sizes = [15, 16], strides = [1, 1]} : vector<16x16xf32> to vector<15x16xf32>
    %31 = tpu.concatenate %29, %30 in 0 : vector<1x16xf32>, vector<15x16xf32> -> vector<16x16xf32>
    %32 = arith.mulf %8, %31 : vector<16x16xf32>
    %33 = arith.addf %28, %32 : vector<16x16xf32>
    %34 = vector.extract_strided_slice %28 {offsets = [1, 0], sizes = [15, 16], strides = [1, 1]} : vector<16x16xf32> to vector<15x16xf32>
    %35 = vector.extract_strided_slice %28 {offsets = [0, 0], sizes = [1, 16], strides = [1, 1]} : vector<16x16xf32> to vector<1x16xf32>
    %36 = tpu.concatenate %34, %35 in 0 : vector<15x16xf32>, vector<1x16xf32> -> vector<16x16xf32>
    %37 = arith.mulf %12, %36 : vector<16x16xf32>
    %38 = arith.addf %33, %37 : vector<16x16xf32>
    %39 = vector.extract_strided_slice %28 {offsets = [0, 15], sizes = [16, 1], strides = [1, 1]} : vector<16x16xf32> to vector<16x1xf32>
    %40 = vector.extract_strided_slice %28 {offsets = [0, 0], sizes = [16, 15], strides = [1, 1]} : vector<16x16xf32> to vector<16x15xf32>
    %41 = tpu.concatenate %39, %40 in 1 : vector<16x1xf32>, vector<16x15xf32> -> vector<16x16xf32>
    %42 = arith.mulf %16, %41 : vector<16x16xf32>
    %43 = arith.addf %38, %42 : vector<16x16xf32>
    %44 = vector.extract_strided_slice %28 {offsets = [0, 1], sizes = [16, 15], strides = [1, 1]} : vector<16x16xf32> to vector<16x15xf32>
    %45 = vector.extract_strided_slice %28 {offsets = [0, 0], sizes = [16, 1], strides = [1, 1]} : vector<16x16xf32> to vector<16x1xf32>
    %46 = tpu.concatenate %44, %45 in 1 : vector<16x15xf32>, vector<16x1xf32> -> vector<16x16xf32>
    %47 = arith.mulf %20, %46 : vector<16x16xf32>
    %48 = arith.addf %43, %47 : vector<16x16xf32>
    %49 = arith.mulf %48, %28 : vector<16x16xf32>
    %cst_14 = arith.constant 0.000000e+00 : f32
    %50 = vector.broadcast %cst_14 : f32 to vector<16x16xf32>
    %51 = arith.cmpf one, %49, %50 : vector<16x16xf32>
    %cst_15 = arith.constant 5.000000e+00 : f32
    %52 = vector.broadcast %cst_15 : f32 to vector<16x16xf32>
    %53 = arith.cmpf one, %49, %52 : vector<16x16xf32>
    %54 = arith.andi %51, %53 : vector<16x16xi1>
    %55 = arith.extui %54 : vector<16x16xi1> to vector<16x16xi32>
    %56 = arith.sitofp %55 : vector<16x16xi32> to vector<16x16xf32>
    %57 = vector.shape_cast %56 : vector<16x16xf32> to vector<1x16x16xf32>
    %cst_16 = arith.constant dense<0.000000e+00> : vector<1xf32>
    %58 = vector.multi_reduction <add>, %57, %cst_16 [1, 2] : vector<1x16x16xf32> to vector<1xf32>
    %59 = vector.shape_cast %58 : vector<1xf32> to vector<1x1x1xf32>
    %60 = vector.extract %59[0, 0, 0] : f32 from vector<1x1x1xf32>
    %61 = arith.addf %cst, %60 : f32
    %cst_17 = arith.constant 0.000000e+00 : f32
    %62 = vector.broadcast %cst_17 : f32 to vector<16x16xf32>
    %63 = arith.cmpf one, %28, %62 : vector<16x16xf32>
    %64 = arith.extui %63 : vector<16x16xi1> to vector<16x16xi32>
    %65 = arith.sitofp %64 : vector<16x16xi32> to vector<16x16xf32>
    %66 = vector.shape_cast %65 : vector<16x16xf32> to vector<1x16x16xf32>
    %cst_18 = arith.constant dense<0.000000e+00> : vector<1xf32>
    %67 = vector.multi_reduction <add>, %66, %cst_18 [1, 2] : vector<1x16x16xf32> to vector<1xf32>
    %68 = vector.shape_cast %67 : vector<1xf32> to vector<1x1x1xf32>
    %69 = vector.extract %68[0, 0, 0] : f32 from vector<1x1x1xf32>
    %70 = arith.addf %cst_4, %69 : f32
    %71 = arith.mulf %24, %28 : vector<16x16xf32>
    %72 = vector.shape_cast %71 : vector<16x16xf32> to vector<1x16x16xf32>
    %cst_19 = arith.constant dense<0.000000e+00> : vector<1xf32>
    %73 = vector.multi_reduction <add>, %72, %cst_19 [1, 2] : vector<1x16x16xf32> to vector<1xf32>
    %74 = vector.shape_cast %73 : vector<1xf32> to vector<1x1x1xf32>
    %75 = vector.extract %74[0, 0, 0] : f32 from vector<1x1x1xf32>
    %76 = arith.addf %cst_5, %75 : f32
    %77 = arith.mulf %28, %28 : vector<16x16xf32>
    %78 = vector.shape_cast %77 : vector<16x16xf32> to vector<1x16x16xf32>
    %cst_20 = arith.constant dense<0.000000e+00> : vector<1xf32>
    %79 = vector.multi_reduction <add>, %78, %cst_20 [1, 2] : vector<1x16x16xf32> to vector<1xf32>
    %80 = vector.shape_cast %79 : vector<1xf32> to vector<1x1x1xf32>
    %81 = vector.extract %80[0, 0, 0] : f32 from vector<1x1x1xf32>
    %82 = arith.addf %cst_6, %81 : f32
    %83 = arith.mulf %24, %24 : vector<16x16xf32>
    %84 = vector.shape_cast %83 : vector<16x16xf32> to vector<1x16x16xf32>
    %cst_21 = arith.constant dense<0.000000e+00> : vector<1xf32>
    %85 = vector.multi_reduction <add>, %84, %cst_21 [1, 2] : vector<1x16x16xf32> to vector<1xf32>
    %86 = vector.shape_cast %85 : vector<1xf32> to vector<1x1x1xf32>
    %87 = vector.extract %86[0, 0, 0] : f32 from vector<1x1x1xf32>
    %88 = arith.addf %cst_7, %87 : f32
    %c1_i32 = arith.constant 1 : i32
    %89 = arith.index_cast %c1_i32 : i32 to index
    %c0_22 = arith.constant 0 : index
    %c0_23 = arith.constant 0 : index
    %c0_24 = arith.constant 0 : index
    %90 = vector.load %arg2[%89, %c0_22, %c0_23, %c0_24] : memref<2x1x16x16xbf16, #tpu.memory_space<vmem>>, vector<1x1x16x16xbf16>
    %91 = vector.shape_cast %90 : vector<1x1x16x16xbf16> to vector<16x16xbf16>
    %92 = arith.extf %91 : vector<16x16xbf16> to vector<16x16xf32>
    %93 = arith.index_cast %c1_i32 : i32 to index
    %c0_25 = arith.constant 0 : index
    %c0_26 = arith.constant 0 : index
    %c0_27 = arith.constant 0 : index
    %94 = vector.load %arg3[%93, %c0_25, %c0_26, %c0_27] : memref<2x1x16x16xbf16, #tpu.memory_space<vmem>>, vector<1x1x16x16xbf16>
    %95 = vector.shape_cast %94 : vector<1x1x16x16xbf16> to vector<16x16xbf16>
    %96 = arith.extf %95 : vector<16x16xbf16> to vector<16x16xf32>
    %97 = vector.extract_strided_slice %96 {offsets = [15, 0], sizes = [1, 16], strides = [1, 1]} : vector<16x16xf32> to vector<1x16xf32>
    %98 = vector.extract_strided_slice %96 {offsets = [0, 0], sizes = [15, 16], strides = [1, 1]} : vector<16x16xf32> to vector<15x16xf32>
    %99 = tpu.concatenate %97, %98 in 0 : vector<1x16xf32>, vector<15x16xf32> -> vector<16x16xf32>
    %100 = arith.mulf %8, %99 : vector<16x16xf32>
    %101 = arith.addf %96, %100 : vector<16x16xf32>
    %102 = vector.extract_strided_slice %96 {offsets = [1, 0], sizes = [15, 16], strides = [1, 1]} : vector<16x16xf32> to vector<15x16xf32>
    %103 = vector.extract_strided_slice %96 {offsets = [0, 0], sizes = [1, 16], strides = [1, 1]} : vector<16x16xf32> to vector<1x16xf32>
    %104 = tpu.concatenate %102, %103 in 0 : vector<15x16xf32>, vector<1x16xf32> -> vector<16x16xf32>
    %105 = arith.mulf %12, %104 : vector<16x16xf32>
    %106 = arith.addf %101, %105 : vector<16x16xf32>
    %107 = vector.extract_strided_slice %96 {offsets = [0, 15], sizes = [16, 1], strides = [1, 1]} : vector<16x16xf32> to vector<16x1xf32>
    %108 = vector.extract_strided_slice %96 {offsets = [0, 0], sizes = [16, 15], strides = [1, 1]} : vector<16x16xf32> to vector<16x15xf32>
    %109 = tpu.concatenate %107, %108 in 1 : vector<16x1xf32>, vector<16x15xf32> -> vector<16x16xf32>
    %110 = arith.mulf %16, %109 : vector<16x16xf32>
    %111 = arith.addf %106, %110 : vector<16x16xf32>
    %112 = vector.extract_strided_slice %96 {offsets = [0, 1], sizes = [16, 15], strides = [1, 1]} : vector<16x16xf32> to vector<16x15xf32>
    %113 = vector.extract_strided_slice %96 {offsets = [0, 0], sizes = [16, 1], strides = [1, 1]} : vector<16x16xf32> to vector<16x1xf32>
    %114 = tpu.concatenate %112, %113 in 1 : vector<16x15xf32>, vector<16x1xf32> -> vector<16x16xf32>
    %115 = arith.mulf %20, %114 : vector<16x16xf32>
    %116 = arith.addf %111, %115 : vector<16x16xf32>
    %117 = arith.mulf %116, %96 : vector<16x16xf32>
    %cst_28 = arith.constant 0.000000e+00 : f32
    %118 = vector.broadcast %cst_28 : f32 to vector<16x16xf32>
    %119 = arith.cmpf one, %117, %118 : vector<16x16xf32>
    %cst_29 = arith.constant 5.000000e+00 : f32
    %120 = vector.broadcast %cst_29 : f32 to vector<16x16xf32>
    %121 = arith.cmpf one, %117, %120 : vector<16x16xf32>
    %122 = arith.andi %119, %121 : vector<16x16xi1>
    %123 = arith.extui %122 : vector<16x16xi1> to vector<16x16xi32>
    %124 = arith.sitofp %123 : vector<16x16xi32> to vector<16x16xf32>
    %125 = vector.shape_cast %124 : vector<16x16xf32> to vector<1x16x16xf32>
    %cst_30 = arith.constant dense<0.000000e+00> : vector<1xf32>
    %126 = vector.multi_reduction <add>, %125, %cst_30 [1, 2] : vector<1x16x16xf32> to vector<1xf32>
    %127 = vector.shape_cast %126 : vector<1xf32> to vector<1x1x1xf32>
    %128 = vector.extract %127[0, 0, 0] : f32 from vector<1x1x1xf32>
    %129 = arith.addf %61, %128 : f32
    %cst_31 = arith.constant 0.000000e+00 : f32
    %130 = vector.broadcast %cst_31 : f32 to vector<16x16xf32>
    %131 = arith.cmpf one, %96, %130 : vector<16x16xf32>
    %132 = arith.extui %131 : vector<16x16xi1> to vector<16x16xi32>
    %133 = arith.sitofp %132 : vector<16x16xi32> to vector<16x16xf32>
    %134 = vector.shape_cast %133 : vector<16x16xf32> to vector<1x16x16xf32>
    %cst_32 = arith.constant dense<0.000000e+00> : vector<1xf32>
    %135 = vector.multi_reduction <add>, %134, %cst_32 [1, 2] : vector<1x16x16xf32> to vector<1xf32>
    %136 = vector.shape_cast %135 : vector<1xf32> to vector<1x1x1xf32>
    %137 = vector.extract %136[0, 0, 0] : f32 from vector<1x1x1xf32>
    %138 = arith.addf %70, %137 : f32
    %139 = arith.mulf %92, %96 : vector<16x16xf32>
    %140 = vector.shape_cast %139 : vector<16x16xf32> to vector<1x16x16xf32>
    %cst_33 = arith.constant dense<0.000000e+00> : vector<1xf32>
    %141 = vector.multi_reduction <add>, %140, %cst_33 [1, 2] : vector<1x16x16xf32> to vector<1xf32>
    %142 = vector.shape_cast %141 : vector<1xf32> to vector<1x1x1xf32>
    %143 = vector.extract %142[0, 0, 0] : f32 from vector<1x1x1xf32>
    %144 = arith.addf %76, %143 : f32
    %145 = arith.mulf %96, %96 : vector<16x16xf32>
    %146 = vector.shape_cast %145 : vector<16x16xf32> to vector<1x16x16xf32>
    %cst_34 = arith.constant dense<0.000000e+00> : vector<1xf32>
    %147 = vector.multi_reduction <add>, %146, %cst_34 [1, 2] : vector<1x16x16xf32> to vector<1xf32>
    %148 = vector.shape_cast %147 : vector<1xf32> to vector<1x1x1xf32>
    %149 = vector.extract %148[0, 0, 0] : f32 from vector<1x1x1xf32>
    %150 = arith.addf %82, %149 : f32
    %151 = arith.mulf %92, %92 : vector<16x16xf32>
    %152 = vector.shape_cast %151 : vector<16x16xf32> to vector<1x16x16xf32>
    %cst_35 = arith.constant dense<0.000000e+00> : vector<1xf32>
    %153 = vector.multi_reduction <add>, %152, %cst_35 [1, 2] : vector<1x16x16xf32> to vector<1xf32>
    %154 = vector.shape_cast %153 : vector<1xf32> to vector<1x1x1xf32>
    %155 = vector.extract %154[0, 0, 0] : f32 from vector<1x1x1xf32>
    %156 = arith.addf %88, %155 : f32
    %c2_i32 = arith.constant 2 : i32
    %157 = tpu.iota {dimensions = array<i32: 0>} : vector<8x128xi32>
    %c0_i32_36 = arith.constant 0 : i32
    %158 = vector.broadcast %c0_i32_36 : i32 to vector<8x128xi32>
    %159 = arith.cmpi eq, %157, %158 : vector<8x128xi32>
    %cst_37 = arith.constant 0.000000e+00 : f32
    %160 = vector.broadcast %129 : f32 to vector<8x128xf32>
    %161 = vector.broadcast %cst_37 : f32 to vector<8x128xf32>
    %162 = arith.select %159, %160, %161 : vector<8x128xi1>, vector<8x128xf32>
    %c1_i32_38 = arith.constant 1 : i32
    %163 = vector.broadcast %c1_i32_38 : i32 to vector<8x128xi32>
    %164 = arith.cmpi eq, %157, %163 : vector<8x128xi32>
    %165 = vector.broadcast %138 : f32 to vector<8x128xf32>
    %166 = arith.select %164, %165, %162 : vector<8x128xi1>, vector<8x128xf32>
    %c2_i32_39 = arith.constant 2 : i32
    %167 = vector.broadcast %c2_i32_39 : i32 to vector<8x128xi32>
    %168 = arith.cmpi eq, %157, %167 : vector<8x128xi32>
    %169 = vector.broadcast %144 : f32 to vector<8x128xf32>
    %170 = arith.select %168, %169, %166 : vector<8x128xi1>, vector<8x128xf32>
    %c3_i32 = arith.constant 3 : i32
    %171 = vector.broadcast %c3_i32 : i32 to vector<8x128xi32>
    %172 = arith.cmpi eq, %157, %171 : vector<8x128xi32>
    %173 = vector.broadcast %150 : f32 to vector<8x128xf32>
    %174 = arith.select %172, %173, %170 : vector<8x128xi1>, vector<8x128xf32>
    %c4_i32 = arith.constant 4 : i32
    %175 = vector.broadcast %c4_i32 : i32 to vector<8x128xi32>
    %176 = arith.cmpi eq, %157, %175 : vector<8x128xi32>
    %177 = vector.broadcast %156 : f32 to vector<8x128xf32>
    %178 = arith.select %176, %177, %174 : vector<8x128xi1>, vector<8x128xf32>
    %c0_40 = arith.constant 0 : index
    %c0_41 = arith.constant 0 : index
    %c0_42 = arith.constant 0 : index
    %179 = vector.load %arg4[%c0_40, %c0_41, %c0_42] : memref<1x8x128xf32, #tpu.memory_space<vmem>>, vector<1x8x128xf32>
    %180 = vector.shape_cast %179 : vector<1x8x128xf32> to vector<8x128xf32>
    %181 = arith.addf %180, %178 : vector<8x128xf32>
    %c0_43 = arith.constant 0 : index
    %c0_44 = arith.constant 0 : index
    %c0_45 = arith.constant 0 : index
    %182 = vector.load %arg4[%c0_43, %c0_44, %c0_45] : memref<1x8x128xf32, #tpu.memory_space<vmem>>, vector<1x8x128xf32>
    %183 = vector.shape_cast %182 : vector<1x8x128xf32> to vector<8x128xf32>
    %184 = vector.shape_cast %181 : vector<8x128xf32> to vector<1x8x128xf32>
    tpu.vector_store %arg4[%c0_43, %c0_44, %c0_45], %184 {strides = array<i32>} : memref<1x8x128xf32, #tpu.memory_space<vmem>>, vector<1x8x128xf32>,
    return
  }
  func.func @transform_0(%arg0: i32, %arg1: i32) -> (i32, i32, i32, i32) {
    %c0_i32 = arith.constant 0 : i32
    %c0_i32_0 = arith.constant 0 : i32
    %c0_i32_1 = arith.constant 0 : i32
    return %arg1, %arg0, %c0_i32, %c0_i32_0 : i32, i32, i32, i32
  }
  func.func @transform_1(%arg0: i32, %arg1: i32) -> (i32, i32, i32, i32) {
    %c0_i32 = arith.constant 0 : i32
    %c0_i32_0 = arith.constant 0 : i32
    %c0_i32_1 = arith.constant 0 : i32
    return %arg1, %arg0, %c0_i32, %c0_i32_0 : i32, i32, i32, i32
  }
  func.func @transform_2(%arg0: i32, %arg1: i32) -> (i32, i32, i32) {
    %c0_i32 = arith.constant 0 : i32
    %c0_i32_0 = arith.constant 0 : i32
    %c0_i32_1 = arith.constant 0 : i32
    return %arg0, %c0_i32, %c0_i32_0 : i32, i32, i32
  }
}

</mosaic_0001>

<bundles_post_ra>
// kernel: tpu_custom_call.1
= control target key start
LH: loop header
LB: loop body
LE: loop exit
PB: predicated region body
PF: predicated region fallthrough
CT: control target
= control target key end

     0   :  { %7 = vsyncpa [#allocation3], 0  ;;  %s1367_s0 = inlined_call_operand.hbm [shape: bf16[2,2,16,16], index: 0, kind: input, shape index: {}]   ;;  %s1368_s1 = inlined_call_operand.hbm [shape: bf16[2,2,16,16], index: 1, kind: input, shape index: {}]   ;;  %s1369_s2 = inlined_call_operand.hbm [shape: f32[2,8,128], index: 2, kind: output, shape index: {}]  }
   0x1   :  { %9 = vsyncpa [#allocation3 + $0x1], 0 }
   0x2   :  { %10 = vsyncpa [#allocation6], 0 }
   0x3   :  { %12 = vsyncpa [#allocation6 + $0x1], 0 }
   0x4   :  { %13 = vsyncpa [#allocation4], 0 }
   0x5   :  { %15 = vsyncpa [#allocation4 + $0x1], 0  ;;  %s1091_s9 = smov 0   ;;  %s1093_s10 = smov 0  }
   0x6   :  { %s1095_s11 = smov 0   ;;  %s1097_s12 = smov 0  }
   0x7   :  { %s1099_s13 = smov 0   ;;  %s1101_s14 = smov 0  }
   0x8 LB: > { %s764_s15 = sadd.s32 4294967295, %s1056_s14   ;;  %s765_s16 = sadd.s32 4294967294, %s1056_s14   ;;  %s1056_s14 = sphi %s1101_s14, %s21_s14   ;;  %s1052_s13 = sphi %s1099_s13, %s1380_s13   ;;  %s1048_s12 = sphi %s1097_s12, %s1379_s12   ;;  %s1044_s11 = sphi %s1095_s11, %s1378_s11   ;;  %s1040_s10 = sphi %s1093_s10, %s1377_s10   ;;  %s1036_s9 = sphi %s1091_s9, %s1376_s9  }
   0x9   : > { %s33_s17 = sadd.s32 1, %s1052_s13  ;;  %s42_s18 = sadd.s32 1, %s1044_s11 }
   0xa   : > { %p35_p0 = scmp.ge.s32.totalorder %s33_s17, 2  ;;  %p49_p1 = scmp.ne.s32.totalorder %s1044_s11, %s1040_s10 }
   0xb   : > { %p50_p2 = scmp.eq.s32.totalorder %s1056_s14, 0  ;;  %p55_p3 = scmp.ne.s32.totalorder %s1040_s10, %s1036_s9 }
   0xc   : > { %s1382_s17 = smov (%p35_p0, %s33_s17), 0  ;;  %p56_p5 = scmp.eq.s32.totalorder %s764_s15, 0 }
   0xd   : > { %p1132_p4 = por %p50_p2, %p49_p1  ;;  %s38_s20 = ssub.s32 %s1052_s13, %s1382_s17 }
   0xe   : > { %p107_p6 = scmp.eq.s32.totalorder %s764_s15, 1  ;;  %p40_p7 = scmp.eq.s32.totalorder %s38_s20, 0 }
   0xf   : > { %p1138_p8 = por %p56_p5, %p55_p3  ;;  %p113_p10 = scmp.eq.s32.totalorder %s765_s16, 1 }
  0x10   : > { %p1142_p9 = por %p107_p6, %p49_p1  ;;  %p1370_p12 = scmp.ge.s32.totalorder %s1056_s14, 2 }
  0x11   : > { %s1147_s23 = scalar_select %p40_p7, %s1044_s11, %s42_s18  }
  0x12   : > { %p1149_p11 = por %p113_p10, %p55_p3  ;;  %129 = sbr.rel (%p1370_p12) target bundleno = 48 (0x30), region = 16 }
  0x17   : > { %s1157_s25 = sand.u32 1, %s1044_s11   ;;  %s802_s26 = sshll.u32 %s1052_s13, 7 }
  0x18   : > { %s768_s27 = sshll.u32 %s1157_s25, 4  ;;  %s146_s30 = scalar_lea.hbm %s1367_s0, %s802_s26 }
  0x19   : > { %s842_s3 = scalar_select %p1132_p4, [#allocation0], [#allocation12] }
  0x1a   : > { %s137_s4 = scalar_lea.vmem [#allocation2], %s768_s27  ;;  %s1058_s7 = smov 256  }
  0x1b   : > { %s159_s5 = sshll.u32 %s137_s4, 4  ;;  %s151_s6 = sld [smem:[%s842_s3]]   ;;  %s160_s5 = int_to_ptr.vmem [resolvable:$true] %s159_s5 }
  0x1c   : > { %843 = sst [smem:[#allocation9]] (%p1132_p4), %s1058_s7  ;;  %s1059_s8 = smov 128  }
  0x1d   : > { %844 = sst [smem:[#allocation9 + $0x1]] (%p1132_p4), %s1059_s8  ;;  %s1060_s15 = smov 2  }
  0x1e   : > { %845 = sst [smem:[#allocation9 + $0x2]] (%p1132_p4), %s1060_s15  ;;  %s1061_s16 = smov 64  }
  0x1f   : > { %846 = sst [smem:[#allocation9 + $0x3]] (%p1132_p4), %s1061_s16  ;;  %s1062_s20 = smov 4  }
  0x20   : > { %847 = sst [smem:[#allocation9 + $0x4]] (%p1132_p4), %s1061_s16  ;;  %s134_s29 = scalar_lea.sflag [#allocation3], %s1157_s25 }
  0x21   : > { %s771_s18 = sshll.u32 %s151_s6, 26  ;;  %848 = sst [smem:[#allocation9 + $0x5]] (%p1132_p4), %s1062_s20 }
  0x22   : > { %s772_s28 = sadd.s32 134217728, %s771_s18  ;;  %s1063_s3 = smov 131072  }
  0x23   : > { %849 = dma.general (%p1132_p4), %s146_s30, 256, %s160_s5, %s134_s29, %s1063_s3, [#allocation9], %s772_s28, 0  }
  0x24   : > { %s195_s8 = scalar_lea.hbm %s1368_s1, %s802_s26  ;;  %s186_s15 = scalar_lea.vmem [#allocation5], %s768_s27 }
  0x25   : > { %s850_s6 = scalar_select %p1132_p4, [#allocation0], [#allocation13] }
  0x26   : > { %s208_s16 = sshll.u32 %s186_s15, 4  ;;  %s1064_s20 = smov 256   ;;  %s209_s16 = int_to_ptr.vmem [resolvable:$true] %s208_s16 }
  0x27   : > { %s200_s18 = sld [smem:[%s850_s6]]   ;;  %s1065_s30 = smov 128  }
  0x28   : > { %851 = sst [smem:[#allocation11]] (%p1132_p4), %s1064_s20  ;;  %s1066_s5 = smov 2  }
  0x29   : > { %852 = sst [smem:[#allocation11 + $0x1]] (%p1132_p4), %s1065_s30  ;;  %s1067_s28 = smov 64  }
  0x2a   : > { %853 = sst [smem:[#allocation11 + $0x2]] (%p1132_p4), %s1066_s5  ;;  %s1068_s27 = smov 4  }
  0x2b   : > { %854 = sst [smem:[#allocation11 + $0x3]] (%p1132_p4), %s1067_s28  ;;  %s183_s3 = scalar_lea.sflag [#allocation6], %s1157_s25 }
  0x2c   : > { %855 = sst [smem:[#allocation11 + $0x4]] (%p1132_p4), %s1067_s28  ;;  %s1069_s4 = smov 131072  }
  0x2d   : > { %s776_s26 = sshll.u32 %s200_s18, 26  ;;  %856 = sst [smem:[#allocation11 + $0x5]] (%p1132_p4), %s1068_s27 }
  0x2e   : > { %s777_s29 = sadd.s32 134217728, %s776_s26 }
  0x2f   : > { %857 = dma.general (%p1132_p4), %s195_s8, 256, %s209_s16, %s183_s3, %s1069_s4, [#allocation11], %s777_s29, 0  }
  0x30 PF: > { %p778_p13 = scmp.ge.s32.totalorder %s1056_s14, 1  ;;  %p229_p0 = scmp.lt.s32.totalorder %s1056_s14, 3 }
  0x32   : > { %p230_p1 = pnand %p778_p13, %p229_p0 }
  0x33   : > { %s1204_s7 = sand.u32 (!%p230_p1), 1, %s1040_s10  }
  0x34   : > { %233 = sbr.rel (%p230_p1) target bundleno = 438 (0x1b6), region = 28  ;;  %s779_s6 = sshll.u32 (!%p230_p1), %s1204_s7, 4 }
  0x35   : > { %s236_s15 = scalar_lea.sflag (!%p230_p1), [#allocation3], %s1204_s7  ;;  %s1208_s18 = scalar_lea.vmem (!%p230_p1), [#allocation2], %s779_s6 }
  0x39   : > { %1023 = dma.done.wait (%p1138_p8), %s236_s15, 256  }
  0x3a   : > { %1025 = vsyncadd (%p1138_p8), %s236_s15, 4294967040  ;;  %s245_s19 = scalar_lea.sflag [#allocation6], %s1204_s7  ;;  %s248_s25 = scalar_lea.vmem [#allocation5], %s779_s6 }
  0x3b   : > { %1027 = dma.done.wait (%p1138_p8), %s245_s19, 256  }
  0x3c   : > { %1029 = vsyncadd (%p1138_p8), %s245_s19, 4294967040  ;;  %v821_v0 = vld [vmem:[%s248_s25 + $0x8] sm:$0xff]   ;;  %v809_v1 = vld [vmem:[%s248_s25] sm:$0xff]   ;;  %s1070_s8 = smov 113   ;;  %s1071_s21 = smov 1   ;;  %vm388_vm0 = vcmask 130048   ;;  %v281_v55 = vlaneseq }
  0x3d   : > { %v1219_v2 = vunpack.c.l.bf16 %v821_v0  ;;  %v1221_v3 = vunpack.c.h.bf16 %v821_v0  ;;  %v1223_v4 = vunpack.c.l.bf16 %v809_v1  ;;  %v1225_v5 = vunpack.c.h.bf16 %v809_v1  ;;  %s1072_s16 = smov 15   ;;  %s1073_s20 = smov 127   ;;  %v820_v8 = vld [vmem:[%s1208_s18 + $0x8] sm:$0xff]   ;;  %v805_v16 = vld [vmem:[%s1208_s18] sm:$0xff]  }
  0x3e   : > { %v814_v9 = vunpack.c.l.bf16 %v820_v8  ;;  %v815_v10 = vunpack.c.h.bf16 %v820_v8  ;;  %v806_v17 = vunpack.c.l.bf16 %v805_v16  ;;  %v807_v18 = vunpack.c.h.bf16 %v805_v16  ;;  %s781_s26 = sshll.u32 %s1204_s7, 3 }
  0x3f   : > { %v942_v6 = vpack.i.bf16 %v1221_v3, %v1219_v2  ;;  %v932_v7 = vpack.i.bf16 %v1225_v5, %v1223_v4  ;;  %vm402_vm1 = vcmp.ne.f32.partialorder %v1223_v4, 0.0  ;;  %vm403_vm2 = vcmp.ne.f32.partialorder %v1225_v5, 0.0 }
  0x40   : > { %v610_v11 = vmul.f32 %v814_v9, %v814_v9  ;;  %v611_v12 = vmul.f32 %v815_v10, %v815_v10  ;;  %v421_v19 = vmul.f32 %v1223_v4, %v806_v17  ;;  %v422_v20 = vmul.f32 %v1225_v5, %v807_v18 }
  0x41   : > { %943 = vrot.lane.b32.xlu1 %v942_v6, %s1070_s8  ;;  %933 = vrot.lane.b32.xlu0 %v932_v7, %s1070_s8  ;;  %v436_v23 = vmul.f32 %v1223_v4, %v1223_v4  ;;  %v437_v24 = vmul.f32 %v1225_v5, %v1225_v5  ;;  %v1074_v25 = vmov 0.0   ;;  %v580_v31 = vmul.f32 %v1219_v2, %v814_v9 }
  0x42   : > { %v612_v13 = vsel %vm388_vm0, %v610_v11, 0.0  ;;  %v613_v14 = vsel %vm388_vm0, %v611_v12, 0.0  ;;  %v423_v21 = vsel %vm388_vm0, %v421_v19, 0.0  ;;  %v424_v22 = vsel %vm388_vm0, %v422_v20, 0.0 }
  0x43   : > { %v1234_v15 = vadd.f32 %v613_v14, %v612_v13  ;;  %v788_v26 = vsel %vm402_vm1, 1.0, %v1074_v25  ;;  %v789_v27 = vsel %vm403_vm2, 1.0, %v1074_v25  ;;  %v425_v28 = vadd.f32 %v424_v22, %v423_v21 }
  0x44   : > { %v438_v29 = vsel %vm388_vm0, %v436_v23, 0.0  ;;  %v439_v30 = vsel %vm388_vm0, %v437_v24, 0.0  ;;  %v581_v32 = vmul.f32 %v1221_v3, %v815_v10  ;;  %v408_v33 = vsel %vm388_vm0, %v788_v26, 0.0 }
  0x45   : > { %948 = vrot.lane.b32.xlu1 %v942_v6, %s1071_s21  ;;  %938 = vrot.lane.b32.xlu0 %v932_v7, %s1071_s21  ;;  %v409_v34 = vsel %vm388_vm0, %v789_v27, 0.0  ;;  %v451_v35 = vmul.f32 %v806_v17, %v806_v17  ;;  %v452_v36 = vmul.f32 %v807_v18, %v807_v18  ;;  %v440_v37 = vadd.f32 %v439_v30, %v438_v29 }
  0x46   : > { %vm561_vm3 = vcmp.ne.f32.partialorder %v1219_v2, 0.0  ;;  %vm562_vm4 = vcmp.ne.f32.partialorder %v1221_v3, 0.0  ;;  %v410_v38 = vadd.f32 %v409_v34, %v408_v33  ;;  %v582_v39 = vsel %vm388_vm0, %v580_v31, 0.0 }
  0x47   : > { %v583_v40 = vsel %vm388_vm0, %v581_v32, 0.0  ;;  %v453_v41 = vsel %vm388_vm0, %v451_v35, 0.0  ;;  %v454_v42 = vsel %vm388_vm0, %v452_v36, 0.0  ;;  %v796_v43 = vsel %vm561_vm3, 1.0, %v1074_v25 }
  0x48   : > { %v797_v44 = vsel %vm562_vm4, 1.0, %v1074_v25  ;;  %v584_v45 = vadd.f32 %v583_v40, %v582_v39  ;;  %v455_v46 = vadd.f32 %v454_v42, %v453_v41  ;;  %v567_v47 = vsel %vm388_vm0, %v796_v43, 0.0 }
  0x49   : > { %958 = vrot.lane.b32.xlu1 %v932_v7, %s1072_s16  ;;  %953 = vrot.lane.b32.xlu0 %v932_v7, %s1073_s20  ;;  %v568_v48 = vsel %vm388_vm0, %v797_v44, 0.0  ;;  %v595_v49 = vmul.f32 %v1219_v2, %v1219_v2  ;;  %v596_v50 = vmul.f32 %v1221_v3, %v1221_v3  ;;  %v1271_v56 = vshrl.u32 %v281_v55, 7 }
  0x4a   : > { %v569_v51 = vadd.f32 %v568_v48, %v567_v47  ;;  %v313_v57 = vrot.slane %v1225_v5, 7  ;;  %v317_v58 = vrot.slane %v1223_v4, 7  ;;  %vm316_vm6 = vcmask 1040384  }
  0x4b   : > { %v597_v52 = vsel %vm388_vm0, %v595_v49, 0.0  ;;  %v598_v53 = vsel %vm388_vm0, %v596_v50, 0.0  ;;  %v283_v59 = vadd.s32 8, %v1271_v56  ;;  %vm286_vm5 = vcmp.gt.s32.totalorder %v1271_v56, 0 }
  0x4c   : > { %v599_v54 = vadd.f32 %v598_v53, %v597_v52  ;;  %v285_v60 = vand.u32 127, %v281_v55  ;;  %v477_v61 = vrot.slane %v1221_v3, 7  ;;  %v480_v62 = vrot.slane %v1219_v2, 7 }
  0x4d   : > { %968 = vrot.lane.b32.xlu1 %v942_v6, %s1072_s16  ;;  %963 = vrot.lane.b32.xlu0 %v942_v6, %s1073_s20  ;;  %v782_v63 = vsel %vm286_vm5, 1.0, %v1074_v25  ;;  %v328_v0 = vrot.slane %v1225_v5, 1  ;;  %v321_v1 = vsel %vm316_vm6, %v313_v57, %v317_v58  ;;  %v327_v6 = vrot.slane %v1223_v4, 1  ;;  %s799_s20 = sshll.u32 %s1048_s12, 7 }
  0x4e   : > { %vm293_vm7 = vcmp.lt.s32.totalorder %v283_v59, 15  ;;  %vm326_vm8 = vcmask 1046528   ;;  %v490_v7 = vrot.slane %v1221_v3, 1  ;;  %v489_v8 = vrot.slane %v1219_v2, 1 }
  0x4f   : > { %vm298_vm9 = vcmp.gt.s32.totalorder %v285_v60, 0  ;;  %v484_v9 = vsel %vm316_vm6, %v477_v61, %v480_v62  ;;  %v322_v10 = vmul.f32 %v782_v63, %v321_v1  ;;  %v783_v13 = vsel %vm293_vm7, 1.0, %v1074_v25 }
  0x50   : > { %v481_v14 = vsel %vm316_vm6, %v480_v62, %v477_v61  ;;  %v318_v16 = vsel %vm316_vm6, %v317_v58, %v313_v57  ;;  %v333_v17 = vsel %vm326_vm8, %v328_v0, %v327_v6  ;;  %v784_v18 = vsel %vm298_vm9, 1.0, %v1074_v25 }
  0x51   : > { %vm350_vm10 = vcmask 7168   ;;  %v495_v19 = vsel %vm326_vm8, %v490_v7, %v489_v8  ;;  %v485_v20 = vmul.f32 %v782_v63, %v484_v9  ;;  %v491_v21 = vsel %vm326_vm8, %v489_v8, %v490_v7 }
  0x52   : > { %vm301_vm11 = vcmp.lt.s32.totalorder %v285_v60, 15  ;;  %vm369_vm12 = vcmask 121856   ;;  %v488_v22 = vadd.f32 %v1221_v3, %v481_v14  ;;  %v324_v23 = vadd.f32 %v1223_v4, %v322_v10 }
  0x53   : > { %v325_v24 = vadd.f32 %v1225_v5, %v318_v16  ;;  %v335_v26 = vmul.f32 %v783_v13, %v333_v17  ;;  %v497_v30 = vmul.f32 %v783_v13, %v495_v19  ;;  %v329_v32 = vsel %vm326_vm8, %v327_v6, %v328_v0 }
  0x54   : > { %v487_v39 = vadd.f32 %v1219_v2, %v485_v20  ;;  %v785_v40 = vsel %vm301_vm11, 1.0, %v1074_v25  ;;  %v336_v41 = vadd.f32 %v329_v32, %v324_v23  ;;  %vm631_vm11 = vcmp.eq.s32.totalorder %v1271_v56, 2 }
  0x55   : > { %v337_v42 = vadd.f32 %v335_v26, %v325_v24  ;;  %v499_v57 = vadd.f32 %v497_v30, %v488_v22 }
  0x56   : > { %v498_v55 = vadd.f32 %v491_v21, %v487_v39 }
  0x6c   : > { %426 = vadd.xlane.f32.xlu0 %v425_v28 }
  0x70   : > { %441 = vadd.xlane.f32.xlu0 %v440_v37 }
  0x71   : > { %411 = vadd.xlane.f32.xlu1 %v410_v38 }
  0x74   : > { %585 = vadd.xlane.f32.xlu0 %v584_v45 }
  0x75   : > { %456 = vadd.xlane.f32.xlu1 %v455_v46 }
  0x79   : > { %570 = vadd.xlane.f32.xlu1 %v569_v51 }
  0x7d   : > { %600 = vadd.xlane.f32.xlu1 %v599_v54 }
  0xb3   : > { %v944_v11 = vpop.permute.xlu1 %943  ;;  %v934_v12 = vpop.permute.xlu0 %933 }
  0xb4   : > { %v936_v27 = vunpack.i.h.bf16 %v934_v12  ;;  %v935_v28 = vunpack.i.l.bf16 %v934_v12  ;;  %v946_v37 = vunpack.i.h.bf16 %v944_v11  ;;  %v945_v38 = vunpack.i.l.bf16 %v944_v11 }
  0xb7   : > { %v949_v29 = vpop.permute.xlu1 %948  ;;  %v939_v31 = vpop.permute.xlu0 %938 }
  0xb8   : > { %v951_v33 = vunpack.i.h.bf16 %v949_v29  ;;  %v950_v34 = vunpack.i.l.bf16 %v949_v29  ;;  %v941_v35 = vunpack.i.h.bf16 %v939_v31  ;;  %v940_v36 = vunpack.i.l.bf16 %v939_v31 }
  0xba   : > { %v351_v43 = vsel %vm350_vm10, %v935_v28, %v940_v36  ;;  %v352_v44 = vsel %vm350_vm10, %v936_v27, %v941_v35  ;;  %v512_v45 = vsel %vm350_vm10, %v945_v38, %v950_v34  ;;  %v513_v46 = vsel %vm350_vm10, %v946_v37, %v951_v33 }
  0xbb   : > { %v353_v47 = vmul.f32 %v784_v18, %v351_v43  ;;  %v354_v48 = vmul.f32 %v784_v18, %v352_v44  ;;  %v959_v49 = vpop.permute.xlu1 %958  ;;  %v954_v50 = vpop.permute.xlu0 %953  ;;  %v514_v58 = vmul.f32 %v784_v18, %v512_v45  ;;  %v515_v59 = vmul.f32 %v784_v18, %v513_v46 }
  0xbc   : > { %v961_v51 = vunpack.i.h.bf16 %v959_v49  ;;  %v960_v52 = vunpack.i.l.bf16 %v959_v49  ;;  %v956_v53 = vunpack.i.h.bf16 %v954_v50  ;;  %v955_v54 = vunpack.i.l.bf16 %v954_v50 }
  0xbd   : > { %v355_v62 = vadd.f32 %v353_v47, %v336_v41  ;;  %v356_v63 = vadd.f32 %v354_v48, %v337_v42  ;;  %v516_v14 = vadd.f32 %v514_v58, %v498_v55  ;;  %v517_v16 = vadd.f32 %v515_v59, %v499_v57 }
  0xbe   : > { %v371_v60 = vsel %vm369_vm12, %v956_v53, %v961_v51  ;;  %v370_v61 = vsel %vm369_vm12, %v955_v54, %v960_v52  ;;  %vm628_vm10 = vcmp.eq.s32.totalorder %v1271_v56, 1 }
  0xbf   : > { %v373_v0 = vmul.f32 %v785_v40, %v371_v60  ;;  %v372_v1 = vmul.f32 %v785_v40, %v370_v61  ;;  %v969_v6 = vpop.permute.xlu1 %968  ;;  %v964_v7 = vpop.permute.xlu0 %963 }
  0xc0   : > { %v971_v8 = vunpack.i.h.bf16 %v969_v6  ;;  %v970_v9 = vunpack.i.l.bf16 %v969_v6  ;;  %v966_v10 = vunpack.i.h.bf16 %v964_v7  ;;  %v965_v11 = vunpack.i.l.bf16 %v964_v7 }
  0xc1   : > { %v374_v12 = vadd.f32 %v372_v1, %v355_v62  ;;  %v375_v13 = vadd.f32 %v373_v0, %v356_v63 }
  0xc2   : > { %v531_v17 = vsel %vm369_vm12, %v966_v10, %v971_v8  ;;  %v530_v18 = vsel %vm369_vm12, %v965_v11, %v970_v9  ;;  %vm634_vm12 = vcmp.eq.s32.totalorder %v1271_v56, 3 }
  0xc3   : > { %v533_v19 = vmul.f32 %v785_v40, %v531_v17  ;;  %v532_v20 = vmul.f32 %v785_v40, %v530_v18  ;;  %v376_v21 = vmul.f32 %v1223_v4, %v374_v12  ;;  %v377_v22 = vmul.f32 %v1225_v5, %v375_v13 }
  0xc5   : > { %v535_v23 = vadd.f32 %v533_v19, %v517_v16  ;;  %v534_v24 = vadd.f32 %v532_v20, %v516_v14  ;;  %vm378_vm13 = vcmp.ne.f32.partialorder %v376_v21, 0.0  ;;  %vm379_vm14 = vcmp.ne.f32.partialorder %v377_v22, 0.0 }
  0xc6   : > { %vm380_vm15 = vcmp.ne.f32.partialorder %v376_v21, 5.0  ;;  %vm381_vm1 = vcmp.ne.f32.partialorder %v377_v22, 5.0 }
  0xc7   : > { %vm382_vm2 = vmand %vm378_vm13, %vm380_vm15  ;;  %v536_v26 = vmul.f32 %v1219_v2, %v534_v24  ;;  %v537_v27 = vmul.f32 %v1221_v3, %v535_v23  ;;  %vm637_vm13 = vcmp.eq.s32.totalorder %v1271_v56, 4 }
  0xc8   : > { %vm383_vm3 = vmand %vm379_vm14, %vm381_vm1  ;;  %v786_v28 = vsel %vm382_vm2, 1.0, %v1074_v25 }
  0xc9   : > { %v787_v29 = vsel %vm383_vm3, 1.0, %v1074_v25  ;;  %v389_v4 = vsel %vm388_vm0, %v786_v28, 0.0  ;;  %vm538_vm4 = vcmp.ne.f32.partialorder %v536_v26, 0.0  ;;  %vm539_vm5 = vcmp.ne.f32.partialorder %v537_v27, 0.0 }
  0xca   : > { %v390_v5 = vsel %vm388_vm0, %v787_v29, 0.0  ;;  %vm540_vm6 = vcmp.ne.f32.partialorder %v536_v26, 5.0  ;;  %vm541_vm7 = vcmp.ne.f32.partialorder %v537_v27, 5.0 }
  0xcb   : > { %v391_v30 = vadd.f32 %v390_v5, %v389_v4  ;;  %vm542_vm8 = vmand %vm538_vm4, %vm540_vm6 }
  0xcc   : > { %vm543_vm9 = vmand %vm539_vm5, %vm541_vm7  ;;  %v794_v2 = vsel %vm542_vm8, 1.0, %v1074_v25 }
  0xcd   : > { %392 = vadd.xlane.f32.xlu0 %v391_v30  ;;  %v795_v3 = vsel %vm543_vm9, 1.0, %v1074_v25  ;;  %v548_v31 = vsel %vm388_vm0, %v794_v2, 0.0 }
  0xce   : > { %v549_v32 = vsel %vm388_vm0, %v795_v3, 0.0  ;;  %vm625_vm0 = vcmp.eq.s32.totalorder %v1271_v56, 0 }
  0xcf   : > { %v550_v33 = vadd.f32 %v549_v32, %v548_v31 }
  0xd1   : > { %551 = vadd.xlane.f32.xlu0 %v550_v33 }
  0xd5   : > { %615 = vadd.xlane.f32.xlu0 %v1234_v15 }
  0xf5   : > { %v427_v35 = vpop.xlane.xlu0 %426 }
  0xf6   : > { %v428_v39 = vrot.slane %v427_v35, 4 }
  0xf8   : > { %v429_v44 = vadd.f32 %v428_v39, %v427_v35 }
  0xf9   : > { %v442_v37 = vpop.xlane.xlu0 %441 }
  0xfa   : > { %v412_v34 = vpop.xlane.xlu1 %411  ;;  %v443_v41 = vrot.slane %v442_v37, 4  ;;  %v430_v51 = vrot.slane %v429_v44, 2 }
  0xfb   : > { %v413_v40 = vrot.slane %v412_v34, 4 }
  0xfc   : > { %v444_v47 = vadd.f32 %v443_v41, %v442_v37  ;;  %v431_v63 = vadd.f32 %v430_v51, %v429_v44 }
  0xfd   : > { %v586_v43 = vpop.xlane.xlu0 %585  ;;  %v414_v25 = vadd.f32 %v413_v40, %v412_v34 }
  0xfe   : > { %v457_v36 = vpop.xlane.xlu1 %456  ;;  %v587_v48 = vrot.slane %v586_v43, 4  ;;  %v445_v55 = vrot.slane %v444_v47, 2  ;;  %v432_v16 = vrot.slane %v431_v63, 1 }
  0xff   : > { %v458_v42 = vrot.slane %v457_v36, 4  ;;  %v415_v15 = vrot.slane %v414_v25, 2 }
 0x100   : > { %v588_v57 = vadd.f32 %v587_v48, %v586_v43  ;;  %v446_v8 = vadd.f32 %v445_v55, %v444_v47  ;;  %v433_v5 = vadd.f32 %v432_v16, %v431_v63 }
 0x101   : > { %v459_v49 = vadd.f32 %v458_v42, %v457_v36  ;;  %v416_v62 = vadd.f32 %v415_v15, %v414_v25 }
 0x102   : > { %v571_v38 = vpop.xlane.xlu1 %570  ;;  %v589_v7 = vrot.slane %v588_v57, 2  ;;  %v447_v21 = vrot.slane %v446_v8, 1 }
 0x103   : > { %v572_v46 = vrot.slane %v571_v38, 4  ;;  %v460_v58 = vrot.slane %v459_v49, 2  ;;  %v417_v14 = vrot.slane %v416_v62, 1 }
 0x104   : > { %v590_v23 = vadd.f32 %v589_v7, %v588_v57  ;;  %v448_v3 = vadd.f32 %v447_v21, %v446_v8 }
 0x105   : > { %v573_v53 = vadd.f32 %v572_v46, %v571_v38  ;;  %v461_v9 = vadd.f32 %v460_v58, %v459_v49  ;;  %v418_v29 = vadd.f32 %v417_v14, %v416_v62 }
 0x106   : > { %v601_v45 = vpop.xlane.xlu1 %600  ;;  %v591_v31 = vrot.slane %v590_v23, 1 }
 0x107   : > { %v602_v50 = vrot.slane %v601_v45, 4  ;;  %v574_v0 = vrot.slane %v573_v53, 2  ;;  %v462_v22 = vrot.slane %v461_v9, 1 }
 0x108   : > { %v592_v38 = vadd.f32 %v591_v31, %v590_v23 }
 0x109   : > { %v603_v60 = vadd.f32 %v602_v50, %v601_v45  ;;  %v575_v20 = vadd.f32 %v574_v0, %v573_v53  ;;  %v463_v33 = vadd.f32 %v462_v22, %v461_v9 }
 0x10b   : > { %v604_v10 = vrot.slane %v603_v60, 2  ;;  %v576_v2 = vrot.slane %v575_v20, 1 }
 0x10d   : > { %v605_v24 = vadd.f32 %v604_v10, %v603_v60  ;;  %v577_v36 = vadd.f32 %v576_v2, %v575_v20 }
 0x10f   : > { %v606_v35 = vrot.slane %v605_v24, 1 }
 0x111   : > { %v607_v39 = vadd.f32 %v606_v35, %v605_v24 }
 0x156   : > { %v393_v52 = vpop.xlane.xlu0 %392 }
 0x157   : > { %v394_v54 = vrot.slane %v393_v52, 4 }
 0x159   : > { %v395_v59 = vadd.f32 %v394_v54, %v393_v52 }
 0x15a   : > { %v552_v61 = vpop.xlane.xlu0 %551 }
 0x15b   : > { %v396_v1 = vrot.slane %v395_v59, 2  ;;  %v553_v6 = vrot.slane %v552_v61, 4 }
 0x15d   : > { %v554_v11 = vadd.f32 %v553_v6, %v552_v61  ;;  %v397_v12 = vadd.f32 %v396_v1, %v395_v59 }
 0x15e   : > { %v616_v13 = vpop.xlane.xlu0 %615 }
 0x15f   : > { %v555_v17 = vrot.slane %v554_v11, 2  ;;  %v617_v18 = vrot.slane %v616_v13, 4  ;;  %v398_v19 = vrot.slane %v397_v12, 1 }
 0x161   : > { %v618_v26 = vadd.f32 %v617_v18, %v616_v13  ;;  %v399_v27 = vadd.f32 %v398_v19, %v397_v12  ;;  %v556_v28 = vadd.f32 %v555_v17, %v554_v11 }
 0x163   : > { %v619_v4 = vrot.slane %v618_v26, 2  ;;  %822 = vpush %v399_v27  ;;  %v557_v30 = vrot.slane %v556_v28, 1 }
 0x164   : > { %824 = vpush %v418_v29 }
 0x165   : > { %v620_v32 = vadd.f32 %v619_v4, %v618_v26  ;;  %826 = vpush %v433_v5  ;;  %v558_v34 = vadd.f32 %v557_v30, %v556_v28 }
 0x166   : > { %828 = vpush %v448_v3 }
 0x167   : > { %830 = vpush %v463_v33  ;;  %v621_v37 = vrot.slane %v620_v32, 1 }
 0x168   : > { %832 = vpush %v558_v34 }
 0x169   : > { %834 = vpush %v577_v36  ;;  %v622_v40 = vadd.f32 %v621_v37, %v620_v32 }
 0x16a   : > { %836 = vpush %v592_v38 }
 0x16b   : > { %838 = vpush %v607_v39 }
 0x16c   : > { %840 = vpush %v622_v40 }
 0x194   : > { %s823_s30 = spop %822 }
 0x195   : > { %s825_s5 = spop %824 }
 0x196   : > { %s827_s28 = spop %826 }
 0x197   : > { %s829_s27 = spop %828 }
 0x198   : > { %s831_s29 = spop %830 }
 0x199   : > { %s833_s3 = spop %832 }
 0x19a   : > { %s560_s4 = sadd.f32 %s833_s3, %s823_s30  ;;  %s835_s6 = spop %834 }
 0x19b   : > { %s579_s15 = sadd.f32 %s835_s6, %s825_s5  ;;  %s837_s18 = spop %836 }
 0x19c   : > { %v626_v41 = vstv %s560_s4  ;;  %s594_s19 = sadd.f32 %s837_s18, %s827_s28  ;;  %s839_s25 = spop %838 }
 0x19d   : > { %v627_v42 = vsel %vm625_vm0, %v626_v41, 0.0  ;;  %v629_v43 = vstv %s579_s15  ;;  %s609_s8 = sadd.f32 %s839_s25, %s829_s27  ;;  %s841_s21 = spop %840 }
 0x19e   : > { %v630_v44 = vsel %vm628_vm10, %v629_v43, %v627_v42  ;;  %v632_v25 = vstv %s594_s19  ;;  %s624_s16 = sadd.f32 %s841_s21, %s831_s29  ;;  %s273_s30 = scalar_lea.vmem [#allocation7], %s781_s26 }
 0x19f   : > { %v633_v45 = vsel %vm631_vm11, %v632_v25, %v630_v44  ;;  %v635_v46 = vstv %s609_s8  ;;  %s657_s5 = sshll.u32 %s273_s30, 4  ;;  %s655_s3 = scalar_lea.hbm %s1369_s2, %s799_s20  ;;  %s658_s5 = int_to_ptr.vmem [resolvable:$true] %s657_s5 }
 0x1a0   : > { %v636_v47 = vsel %vm634_vm12, %v635_v46, %v633_v45  ;;  %v638_v48 = vstv %s624_s16  ;;  %s644_s4 = scalar_lea.sflag [#allocation4], %s1204_s7  ;;  %s972_s6 = scalar_lea.vmem %s658_s5, 128 }
 0x1a1   : > { %v639_v49 = vsel %vm637_vm13, %v638_v48, %v636_v47  ;;  %p973_p2 = scmp.ne.s32.totalorder %s658_s5, %s972_s6  ;;  %s1075_s29 = smov [#allocation7]  }
 0x1a2   : > { %642 = vst [vmem:[%s273_s30] sm:$0xff] %v639_v49  ;;  %s976_s15 = sshll.u32 %s1075_s29, 4  ;;  %s977_s15 = int_to_ptr.vmem [resolvable:$false] %s976_s15 }
 0x1a3   : > { %p974_p3 = pnand %p973_p2, %p1142_p9  ;;  %s978_s12 = scalar_lea.vmem %s977_s15, 256 }
 0x1a4   : > { %p979_p5 = scmp.lt.s32.totalorder %s658_s5, %s977_s15  ;;  %p980_p6 = scmp.lt.s32.totalorder %s978_s12, %s972_s6 }
 0x1a5   : > { %p975_p4 = pneg %p974_p3 }
 0x1a6   : > { %p981_p7 = por %p980_p6, %p979_p5 }
 0x1a8   : > { %p982_p8 = pnand %p981_p7, %p975_p4 }
 0x1aa   : > { %985 = shalt.err (!%p982_p8)
}
 0x1ab   : > { %s986_s26 = scalar_lea.hbm %s655_s3, 128  ;;  %s990_s19 = scalar_lea.hbm %s1369_s2, 256 }
 0x1ac   : > { %p987_p10 = scmp.ne.s32.totalorder %s655_s3, %s986_s26  ;;  %p991_p1 = scmp.lt.s32.totalorder %s655_s3, %s1369_s2 }
 0x1ad   : > { %p992_p2 = scmp.lt.s32.totalorder %s990_s19, %s986_s26 }
 0x1ae   : > { %p988_p13 = pnand %p987_p10, %p1142_p9 }
 0x1af   : > { %p993_p3 = por %p992_p2, %p991_p1 }
 0x1b0   : > { %p989_p0 = pneg %p988_p13 }
 0x1b2   : > { %p994_p12 = pnand %p993_p3, %p989_p0 }
 0x1b4   : > { %997 = shalt.err (!%p994_p12)
}
 0x1b5   : > { %860 = dma.vmem_to_hbm [thread:$0]  (%p1142_p9), %s658_s5, 128, %s655_s3, %s644_s4  }
 0x1b6 PF: > { %s669_s21 = sand.u32 1, %s1036_s9   ;;  %p1375_p4 = scmp.ge.s32.totalorder %s1056_s14, 2 }
 0x1b7   : > { %s670_s16 = scalar_lea.sflag [#allocation4], %s669_s21 }
 0x1b8   : > { %p863_p5 = pnand %p1375_p4, %p1149_p11 }
 0x1ba   : > { %p864_p6 = pneg %p863_p5 }
 0x1bc   : > { %1031 = dma.done.wait (%p864_p6), %s670_s16, 128  }
 0x1bd   : > { %1033 = vsyncadd (%p864_p6), %s670_s16, 4294967168  ;;  %s21_s14 = sadd.s32 1, %s1056_s14   ;;  %s1376_s9 = smov %s1040_s10 }
 0x1be   : > { %p18_p7 = scmp.ge.s32.totalorder %s21_s14, 4   ;;  %s1377_s10 = smov %s1044_s11 }
 0x1bf   : > { %s1378_s11 = smov %s1147_s23  ;;  %s1379_s12 = smov %s1052_s13 }
 0x1c0   : > { %s1380_s13 = smov %s1382_s17  ;;  %20 = sbr.rel (!%p18_p7) target bundleno = 8 (0x8), region = 102 }
 0x1c5   :  { %675 = vsyncpa [#allocation3], 1 }
 0x1c6   :  { %677 = vsyncpa [#allocation3 + $0x1], 1 }
 0x1c7   :  { %678 = vsyncpa [#allocation6], 1 }
 0x1c8   :  { %680 = vsyncpa [#allocation6 + $0x1], 1 }
 0x1c9   :  { %681 = vsyncpa [#allocation4], 1 }
 0x1ca   :  { %683 = vsyncpa [#allocation4 + $0x1], 1 }

</bundles_post_ra>
